<compile_context>
chip_gen: v7x
topology: tpu7x:2x2x1
jax: 0.10.0
libtpu: 0.0.40
codegen_flags: <defaults>
</compile_context>

<pallas_src>
import math
import functools

import jax
import jax.numpy as jnp
from jax.experimental import pallas as pl
from jax.experimental.pallas import tpu as pltpu

_LANE = 128
_TARGET_TILE_BYTES = 8 << 20      # ~8 MiB per (padded) x tile
_VMEM_LIMIT_BYTES = 48 << 20      # 2x in + 2x out + small weight, < 64 MiB


def _cprelu_shared_kernel(w_ref, x_ref, o_ref, *, post_mean, inv_post_stdv):
    # w_ref: (1,) SMEM scalar-prefetch ref holding the single PReLU weight.
    w = w_ref[0]
    x = x_ref[...]
    y = jnp.where(x >= 0, x, w * x)
    o_ref[...] = (y - post_mean) * inv_post_stdv


def _cprelu_perchannel_kernel(x_ref, w_ref, o_ref, *, post_mean, inv_post_stdv):
    x = x_ref[...]                      # (tr, tc)
    w = w_ref[...]                      # (tr, 1) -> broadcasts over lanes
    y = jnp.where(x >= 0, x, w * x)
    o_ref[...] = (y - post_mean) * inv_post_stdv


def _choose_tiles(rows, cols, itemsize, sublane, extra_row_bytes=0):
    """Pick (tr, tc) so the padded x tile stays <= ~8 MiB and the grid keeps
    enough steps for megacore sharding + DMA/compute overlap."""
    padded_cols = -(-cols // _LANE) * _LANE

    # ---- column tile: full extent when a sublane-group of padded rows fits
    # the budget, otherwise a multiple-of-128 lane tile capped at 8192 lanes.
    if padded_cols * itemsize * min(rows, sublane) <= _TARGET_TILE_BYTES:
        tc, padded_tc = cols, padded_cols
    else:
        tc = max(_LANE, (min(padded_cols, 8192) // _LANE) * _LANE)
        padded_tc = tc

    # ---- row tile from the *padded* per-row footprint (+ weight padding).
    row_bytes = padded_tc * itemsize + extra_row_bytes
    tr = max(1, _TARGET_TILE_BYTES // row_bytes)
    if tr >= rows:
        tr = rows                       # full dim (always legal)
    else:
        tr = max(sublane, (tr // sublane) * sublane)

    # ---- if all rows fit in one block, widen the lane tile to use the budget
    # (keeps per-step DMA large for very wide, short tensors).
    if tr == rows and tc < cols:
        avail = _TARGET_TILE_BYTES - rows * extra_row_bytes
        if avail > 0:
            lane_budget = avail // (rows * itemsize)
            if lane_budget >= padded_cols:
                tc = cols
            elif lane_budget >= _LANE:
                tc = max(tc, (lane_budget // _LANE) * _LANE)

    # ---- keep the grid populated: >= 8 steps for anything beyond a few MiB
    # so both v7x TensorCores stream and double-buffering stays alive.
    total_bytes = rows * padded_cols * itemsize
    min_steps = 8 if total_bytes > (4 << 20) else 1

    def steps(tr_, tc_):
        return (-(-rows // tr_)) * (-(-cols // tc_))

    while steps(tr, tc) < min_steps:
        if tr > sublane:
            tr = max(sublane, ((tr // 2) // sublane) * sublane)
        elif tc > _LANE:
            tc = max(_LANE, ((tc // 2) // _LANE) * _LANE)
        else:
            break
    return tr, tc


def _sublane_multiple(dtype):
    itemsize = jnp.dtype(dtype).itemsize
    return max(8, 32 // itemsize)       # 8 f32, 16 bf16, 32 int8/fp8


def _run_shared(x2d, weight1, post_mean, post_stdv):
    """Shared PReLU weight: scalar goes in via SMEM scalar-prefetch."""
    rows, cols = x2d.shape
    itemsize = jnp.dtype(x2d.dtype).itemsize
    sublane = _sublane_multiple(x2d.dtype)
    tr, tc = _choose_tiles(rows, cols, itemsize, sublane, extra_row_bytes=0)
    grid = (pl.cdiv(rows, tr), pl.cdiv(cols, tc))

    kernel = functools.partial(
        _cprelu_shared_kernel,
        post_mean=float(post_mean),
        inv_post_stdv=float(1.0 / post_stdv),
    )
    return pl.pallas_call(
        kernel,
        out_shape=jax.ShapeDtypeStruct((rows, cols), x2d.dtype),
        grid_spec=pltpu.PrefetchScalarGridSpec(
            num_scalar_prefetch=1,
            grid=grid,
            in_specs=[pl.BlockSpec((tr, tc), lambda i, j, w: (i, j))],
            out_specs=pl.BlockSpec((tr, tc), lambda i, j, w: (i, j)),
        ),
        compiler_params=pltpu.CompilerParams(
            dimension_semantics=("parallel", "parallel"),
            vmem_limit_bytes=_VMEM_LIMIT_BYTES,
        ),
    )(weight1.astype(x2d.dtype).reshape(1), x2d)


def _run_perchannel(x2d, w_col, post_mean, post_stdv):
    """Per-channel weight: (rows, 1) column, re-DMA'd only when the row tile
    changes (column axis is the fastest grid axis)."""
    rows, cols = x2d.shape
    itemsize = jnp.dtype(x2d.dtype).itemsize
    sublane = _sublane_multiple(x2d.dtype)
    # (tr, 1) weight block pads to tr x 128 lanes in VMEM -> include it.
    tr, tc = _choose_tiles(rows, cols, itemsize, sublane,
                           extra_row_bytes=_LANE * itemsize)
    grid = (pl.cdiv(rows, tr), pl.cdiv(cols, tc))

    kernel = functools.partial(
        _cprelu_perchannel_kernel,
        post_mean=float(post_mean),
        inv_post_stdv=float(1.0 / post_stdv),
    )
    return pl.pallas_call(
        kernel,
        out_shape=jax.ShapeDtypeStruct((rows, cols), x2d.dtype),
        grid_spec=pltpu.PrefetchScalarGridSpec(
            num_scalar_prefetch=0,
            grid=grid,
            in_specs=[
                pl.BlockSpec((tr, tc), lambda i, j: (i, j)),
                pl.BlockSpec((tr, 1), lambda i, j: (i, 0)),
            ],
            out_specs=pl.BlockSpec((tr, tc), lambda i, j: (i, j)),
        ),
        compiler_params=pltpu.CompilerParams(
            dimension_semantics=("parallel", "parallel"),
            vmem_limit_bytes=_VMEM_LIMIT_BYTES,
        ),
    )(x2d, w_col)


def cprelu(x_nchw, weight, init=0.25):
    """x_nchw: (N, C, H, W). weight: (num_parameters,) with 1 or C entries."""
    N, C, H, W = x_nchw.shape
    num_parameters = int(weight.shape[0])

    post_mean = (1.0 - init) / math.sqrt(2.0 * math.pi)
    post_ex2 = (1.0 + init ** 2) / 2.0
    post_stdv = math.sqrt(post_ex2 - post_mean ** 2)

    cols = H * W
    total = N * C * H * W

    if num_parameters == 1:
        # Layout is free: regroup into a lane-dense slab (last dim a multiple
        # of 128, >= 8 rows when possible) so stores are unmasked.
        if total % _LANE == 0:
            lanes = _LANE
            while (total % (lanes * 2) == 0 and lanes * 2 <= 8192
                   and total // (lanes * 2) >= 8):
                lanes *= 2
            rows = total // lanes
            x2d = x_nchw.reshape(rows, lanes)
        else:
            rows = N * C
            x2d = x_nchw.reshape(rows, cols)   # masked edge stores, correct
        out2d = _run_shared(x2d, weight, post_mean, post_stdv)
        return out2d.reshape(N, C, H, W)

    assert num_parameters == C, "PReLU weight must have 1 or C parameters"
    rows = N * C
    x2d = x_nchw.reshape(rows, cols)
    w_col = jnp.tile(weight.astype(x2d.dtype), (N,)).reshape(rows, 1)
    out2d = _run_perchannel(x2d, w_col, post_mean, post_stdv)
    return out2d.reshape(N, C, H, W)


def _reference(x, weight, init):
    post_mean = (1.0 - init) / math.sqrt(2.0 * math.pi)
    post_ex2 = (1.0 + init ** 2) / 2.0
    post_stdv = math.sqrt(post_ex2 - post_mean ** 2)
    C = x.shape[1]
    if weight.shape[0] == 1:
        w_b = weight.reshape(1, 1, 1, 1)
    else:
        w_b = weight.reshape(1, C, 1, 1)
    return (jnp.where(x >= 0, x, w_b * x) - post_mean) / post_stdv


if __name__ == "__main__":
    key = jax.random.PRNGKey(0)
    N, C, H, W = 2, 4, 16, 16
    init = 0.25

    x = jax.random.normal(key, (N, C, H, W), dtype=jnp.float32)

    # Per-channel weight (num_parameters == C).
    weight_c = jnp.full((C,), init, dtype=jnp.float32)
    out_c = jax.block_until_ready(cprelu(x, weight_c, init=init))
    ref_c = _reference(x, weight_c, init)
    assert jnp.allclose(out_c, ref_c, atol=1e-5, rtol=1e-5), "mismatch (per-channel)"

    # Shared weight (num_parameters == 1), the module's default.
    weight_1 = jnp.full((1,), init, dtype=jnp.float32)
    out_1 = jax.block_until_ready(cprelu(x, weight_1, init=init))
    ref_1 = _reference(x, weight_1, init)
    assert jnp.allclose(out_1, ref_1, atol=1e-5, rtol=1e-5), "mismatch (shared)"

    print("KERNEL_OK")
</pallas_src>

<mosaic_0001>
module attributes {stable_mosaic.version = 11 : i64} {
  func.func @_cprelu_perchannel_kernel(%arg0: i32, %arg1: i32, %arg2: memref<8x256xf32, #tpu.memory_space<vmem>>, %arg3: memref<8x1xf32, #tpu.memory_space<vmem>>, %arg4: memref<8x256xf32, #tpu.memory_space<vmem>>) attributes {dimension_semantics = [#tpu.dimension_semantics<parallel>, #tpu.dimension_semantics<parallel>], iteration_bounds = array<i64: 1, 1>, scalar_prefetch = 0 : i64, scratch_operands = 0 : i64, tpu.core_type = #tpu.core_type<tc>, window_params = [{transform_indices = @transform_0, window_bounds = array<i64: 8, 256>}, {transform_indices = @transform_1, window_bounds = array<i64: 8, 1>}, {transform_indices = @transform_2, window_bounds = array<i64: 8, 256>}]} {
    %c0 = arith.constant 0 : index
    %c0_0 = arith.constant 0 : index
    %0 = vector.load %arg2[%c0, %c0_0] : memref<8x256xf32, #tpu.memory_space<vmem>>, vector<8x256xf32>
    %c0_1 = arith.constant 0 : index
    %c0_2 = arith.constant 0 : index
    %1 = vector.load %arg3[%c0_1, %c0_2] : memref<8x1xf32, #tpu.memory_space<vmem>>, vector<8x1xf32>
    %cst = arith.constant 0.000000e+00 : f32
    %2 = vector.broadcast %cst : f32 to vector<8x256xf32>
    %3 = arith.cmpf oge, %0, %2 : vector<8x256xf32>
    %4 = vector.broadcast %1 : vector<8x1xf32> to vector<8x256xf32>
    %5 = arith.mulf %4, %0 : vector<8x256xf32>
    %6 = arith.select %3, %0, %5 : vector<8x256xi1>, vector<8x256xf32>
    %cst_3 = arith.constant 0.299206704 : f32
    %7 = vector.broadcast %cst_3 : f32 to vector<8x256xf32>
    %8 = arith.subf %6, %7 : vector<8x256xf32>
    %cst_4 = arith.constant 1.50460958 : f32
    %9 = vector.broadcast %cst_4 : f32 to vector<8x256xf32>
    %10 = arith.mulf %8, %9 : vector<8x256xf32>
    %c0_5 = arith.constant 0 : index
    %c0_6 = arith.constant 0 : index
    %11 = vector.load %arg4[%c0_5, %c0_6] : memref<8x256xf32, #tpu.memory_space<vmem>>, vector<8x256xf32>
    tpu.vector_store %arg4[%c0_5, %c0_6], %10 {strides = array<i32>} : memref<8x256xf32, #tpu.memory_space<vmem>>, vector<8x256xf32>,
    return
  }
  func.func @transform_0(%arg0: i32, %arg1: i32) -> (i32, i32) {
    %c0_i32 = arith.constant 0 : i32
    return %arg0, %arg1 : i32, i32
  }
  func.func @transform_1(%arg0: i32, %arg1: i32) -> (i32, i32) {
    %c0_i32 = arith.constant 0 : i32
    %c0_i32_0 = arith.constant 0 : i32
    return %arg0, %c0_i32 : i32, i32
  }
  func.func @transform_2(%arg0: i32, %arg1: i32) -> (i32, i32) {
    %c0_i32 = arith.constant 0 : i32
    return %arg0, %arg1 : i32, i32
  }
}

</mosaic_0001>

<bundles_post_ra>
// kernel: tpu_custom_call.1
= control target key start
LH: loop header
LB: loop body
LE: loop exit
PB: predicated region body
PF: predicated region fallthrough
CT: control target
= control target key end

     0   :  { %7 = vsyncpa [#allocation3], 0  ;;  %s158_s0 = inlined_call_operand.hbm [shape: f32[8,256], index: 0, kind: input, shape index: {}]   ;;  %s159_s1 = inlined_call_operand.vmem [shape: f32[8,1], index: 1, kind: input, shape index: {}]   ;;  %s160_s2 = inlined_call_operand.hbm [shape: f32[8,256], index: 2, kind: output, shape index: {}]  }
   0x1   :  { %8 = vsyncpa [#allocation4], 0  ;;  %s113_s9 = smov [#allocation2]   ;;  %s65_s13 = scalar_lea.hbm %s158_s0, 256 }
   0x2   :  { %s15_s10 = sshll.u32 %s113_s9, 4  ;;  %p66_p0 = scmp.ne.s32.totalorder %s158_s0, %s65_s13  ;;  %s16_s10 = int_to_ptr.vmem [resolvable:$true] %s15_s10 }
   0x3   :  { %p69_p1 = scmp.lt.u32.totalorder %s65_s13, %s158_s0 }
   0x5   :  { %p71_p2 = pnand %p69_p1, %p66_p0 }
   0x7   :  { %74 = shalt.err (!%p71_p2)
}
   0x8   :  { %s75_s18 = scalar_lea.vmem %s16_s10, 256  ;;  %p80_p4 = scmp.lt.s32.totalorder %s16_s10, %s16_s10 }
   0x9   :  { %p76_p3 = scmp.ne.s32.totalorder %s16_s10, %s75_s18  ;;  %p81_p5 = scmp.lt.s32.totalorder %s75_s18, %s75_s18 }
   0xb   :  { %p82_p6 = por %p81_p5, %p80_p4 }
   0xd   :  { %p83_p7 = pnand %p82_p6, %p76_p3 }
   0xf   :  { %86 = shalt.err (!%p83_p7)
}
  0x10   :  { %18 = dma.hbm_to_vmem [thread:$0]  %s158_s0, 256, %s16_s10, [#allocation3]  }
  0x11   :  { %109 = dma.done.wait [#allocation3], 256  }
  0x12   :  { %110 = vsyncadd [#allocation3], 4294967040  ;;  %v114_v0 = vmov 0   ;;  %v26_v1 = vld [vmem:[%s159_s1] sm:$0xff]  ;;  %v25_v3 = vld [vmem:[#allocation2 + $0x8] sm:$0xff]  ;;  %s115_s23 = smov [#allocation5]  }
  0x13   :  { %64 = vset.pattern.permute.xlu0 %v114_v0  ;;  %v24_v2 = vld [vmem:[#allocation2] sm:$0xff]  ;;  %vm28_vm1 = vcmp.ge.f32.partialorder %v25_v3, 0.0  ;;  %s50_s0 = sshll.u32 %s115_s23, 4  ;;  %s51_s0 = int_to_ptr.vmem [resolvable:$true] %s50_s0 }
  0x14   :  { %31 = vperm.xlu0 %64, %v26_v1   ;;  %vm27_vm0 = vcmp.ge.f32.partialorder %v24_v2, 0.0  ;;  %s87_s1 = scalar_lea.vmem %s51_s0, 256  ;;  %p92_p9 = scmp.lt.s32.totalorder %s51_s0, %s51_s0 }
  0x15   :  { %p88_p8 = scmp.ne.s32.totalorder %s51_s0, %s87_s1  ;;  %p93_p10 = scmp.lt.s32.totalorder %s87_s1, %s87_s1 }
  0x17   :  { %p94_p11 = por %p93_p10, %p92_p9 }
  0x19   :  { %p95_p12 = pnand %p94_p11, %p88_p8 }
  0x93   :  { %v32_v4 = vpop.permute.xlu0 %31 }
  0x94   :  { %v34_v5 = vmul.f32 %v32_v4, %v24_v2  ;;  %v35_v6 = vmul.f32 %v32_v4, %v25_v3 }
  0x96   :  { %v36_v7 = vsel %vm27_vm0, %v24_v2, %v34_v5  ;;  %v37_v8 = vsel %vm28_vm1, %v25_v3, %v35_v6 }
  0x97   :  { %v59_v9 = vadd.f32 -0.2992067, %v36_v7  ;;  %v60_v10 = vadd.f32 -0.2992067, %v37_v8 }
  0x99   :  { %v40_v11 = vmul.f32 1.5046096, %v59_v9  ;;  %v41_v12 = vmul.f32 1.5046096, %v60_v10 }
  0x9b   :  { %42 = vst [vmem:[#allocation5] sm:$0xff] %v40_v11  ;;  %43 = vst [vmem:[#allocation5 + $0x8] sm:$0xff] %v41_v12 }
  0x9c   :  { %98 = shalt.err (!%p95_p12)
}
  0x9d   :  { %s99_s26 = scalar_lea.hbm %s160_s2, 256 }
  0x9e   :  { %p100_p13 = scmp.ne.s32.totalorder %s160_s2, %s99_s26  ;;  %p103_p0 = scmp.lt.u32.totalorder %s99_s26, %s160_s2 }
  0xa0   :  { %p105_p1 = pnand %p103_p0, %p100_p13 }
  0xa2   :  { %108 = shalt.err (!%p105_p1)
}
  0xa3   :  { %53 = dma.vmem_to_hbm [thread:$0]  %s51_s0, 256, %s160_s2, [#allocation4]  }
  0xa4   :  { %111 = dma.done.wait [#allocation4], 256  }
  0xa5   :  { %112 = vsyncadd [#allocation4], 4294967040 }
  0xa6   :  { %57 = vsyncpa [#allocation3], 1 }
  0xa7   :  { %58 = vsyncpa [#allocation4], 1 }

</bundles_post_ra>
